<compile_context>
chip_gen: v7x
topology: tpu7x:2x2x1
jax: 0.10.0
libtpu: 0.0.40
codegen_flags: <defaults>
</compile_context>

<pallas_src>
import numpy as np
import jax
import jax.numpy as jnp
from jax.experimental import pallas as pl
from jax.experimental.pallas import tpu as pltpu


def _cdiv(a, b):
    return (a + b - 1) // b


def _round_up(x, m):
    return ((x + m - 1) // m) * m


# ----------------------------------------------------------------------------
# Deterministic quaternion weight init (mirrors quaternion_init, glorot
# criterion, kernel_size=None), implemented in numpy with a fixed seed.
# chi(4)-distributed modulus is sampled as sqrt of sum of 4 squared normals.
# ----------------------------------------------------------------------------
def quaternion_init_np(in_features, out_features, seed=0, criterion="glorot"):
    rng = np.random.RandomState(seed)
    fan_in, fan_out = in_features, out_features
    if criterion == "glorot":
        s = 1.0 / np.sqrt(2.0 * (fan_in + fan_out))
    elif criterion == "he":
        s = 1.0 / np.sqrt(2.0 * fan_in)
    else:
        raise ValueError(criterion)

    kernel_shape = (in_features, out_features)
    n = int(np.prod(kernel_shape))

    normals = rng.normal(0.0, 1.0, size=(4, n))
    modulus = (s * np.sqrt((normals ** 2).sum(axis=0))).reshape(kernel_shape)

    v_i = rng.normal(0.0, 1.0, n)
    v_j = rng.normal(0.0, 1.0, n)
    v_k = rng.normal(0.0, 1.0, n)
    norm = np.sqrt(v_i ** 2 + v_j ** 2 + v_k ** 2 + 1e-4)
    v_i = (v_i / norm).reshape(kernel_shape)
    v_j = (v_j / norm).reshape(kernel_shape)
    v_k = (v_k / norm).reshape(kernel_shape)

    phase = rng.uniform(low=-np.pi, high=np.pi, size=kernel_shape)
    weight_r = modulus * np.cos(phase)
    weight_i = modulus * v_i * np.sin(phase)
    weight_j = modulus * v_j * np.sin(phase)
    weight_k = modulus * v_k * np.sin(phase)
    return (weight_r.astype(np.float32), weight_i.astype(np.float32),
            weight_j.astype(np.float32), weight_k.astype(np.float32))


# ----------------------------------------------------------------------------
# Quaternion block-matrix assembly (done ONCE, outside the hot path)
# ----------------------------------------------------------------------------
def _build_quaternion_weight(r_w, i_w, j_w, k_w):
    col_r = jnp.concatenate([r_w, -i_w, -j_w, -k_w], axis=0)
    col_i = jnp.concatenate([i_w,  r_w, -k_w,  j_w], axis=0)
    col_j = jnp.concatenate([j_w,  k_w,  r_w, -i_w], axis=0)
    col_k = jnp.concatenate([k_w, -j_w,  i_w,  r_w], axis=0)
    return jnp.concatenate([col_r, col_i, col_j, col_k], axis=1)  # (4*in4, 4*out4)


def prepare_quaternion_params(r_w, i_w, j_w, k_w, bias=None,
                              compute_dtype=jnp.bfloat16):
    """Build and cast the quaternion weight once (no per-forward assembly)."""
    in4, out4 = r_w.shape
    K, N = 4 * in4, 4 * out4
    W = _build_quaternion_weight(r_w, i_w, j_w, k_w).astype(jnp.float32)
    if bias is None:
        bias = jnp.zeros((N,), dtype=jnp.float32)
    return {
        "W": W.astype(compute_dtype),                       # (K, N) bf16
        "bias": bias.astype(jnp.float32).reshape(1, N),     # (1, N) f32
        "K": K,
        "N": N,
    }


# ----------------------------------------------------------------------------
# Pallas kernel: single-K-step fused (x tile) @ (resident W slab) + bias
# ----------------------------------------------------------------------------
def _qlinear_kernel(x_ref, w_ref, b_ref, o_ref):
    # Whole reduction resident in VMEM -> no f32 scratch accumulator and no
    # pl.when init/finalize.  The x cast is a no-op when x is already bf16;
    # the MXU accumulates in f32 via preferred_element_type.
    acc = jnp.dot(x_ref[...].astype(w_ref.dtype), w_ref[...],
                  preferred_element_type=jnp.float32)
    o_ref[...] = (acc + b_ref[...]).astype(o_ref.dtype)


def _vmem_capacity_bytes():
    try:
        info = pltpu.get_tpu_info()
        cap = int(getattr(info, "vmem_capacity_bytes", 0))
        if cap > 0:
            return cap
    except Exception:
        pass
    return 64 * 1024 * 1024  # conservative fallback (v7x per-TC physical VMEM)


def _select_tiles(M, K, N, x_item, w_item, out_item, tile_budget):
    """Pick (tm, tn). Returns None if even minimal tiles do not fit VMEM."""
    # tn: keep the whole (K, tn) weight slab VMEM-resident.  Prefer full N
    # (weight DMA'd exactly once, 1-D grid over M); otherwise the largest
    # 128-multiple divisor -> 256-multiples are preferred whenever N allows,
    # which keeps the v6e/v7x 2x256^2 MXU full.
    tn = None
    for cand in (N, 2048, 1024, 512, 256, 128):
        if cand > N or N % cand != 0 or cand % 128 != 0:
            continue
        if 2 * K * cand * w_item <= tile_budget // 3:
            tn = cand
            break
    if tn is None:
        return None

    rem = tile_budget - 2 * K * tn * w_item - 2 * tn * 4
    per_row = 2 * K * x_item + 2 * tn * out_item   # double-buffered x + out rows
    if rem < 8 * per_row:
        return None
    tm_cap = min(1024, max(8, (rem // per_row) // 8 * 8))

    if M <= 256:
        tm = M if M <= tm_cap else tm_cap
    else:
        # Keep >= 2 M-steps so both v7x TensorCores get work; tm multiple of 8.
        tm = min(tm_cap, _round_up(_cdiv(M, 2), 8))
    return tm, tn


def _qlinear_matmul(x2d, w, bias2d, out_dtype):
    M, K = x2d.shape
    K2, N = w.shape
    assert K == K2, (K, K2)

    capacity = _vmem_capacity_bytes()
    tiles = _select_tiles(M, K, N,
                          x2d.dtype.itemsize, w.dtype.itemsize,
                          jnp.dtype(out_dtype).itemsize,
                          int(capacity * 0.6))
    if tiles is None:
        # TODO(synk): add a K-tiled accumulator path for weights too large for VMEM.
        return None
    tm, tn = tiles
    grid = (_cdiv(M, tm), _cdiv(N, tn))

    out_item = jnp.dtype(out_dtype).itemsize
    need = (2 * K * tn * w.dtype.itemsize        # W slab (worst-case double buffer)
            + 2 * tn * 4                         # bias row
            + 2 * tm * K * x2d.dtype.itemsize    # x tiles (double-buffered)
            + 2 * tm * tn * out_item)            # out tiles (double-buffered)
    vmem_limit = int(min(int(capacity * 0.75),
                         max(2 * need, 32 * 1024 * 1024)))

    cost = pl.CostEstimate(
        flops=2 * M * K * N,
        transcendentals=0,
        bytes_accessed=(M * K * x2d.dtype.itemsize + K * N * w.dtype.itemsize
                        + N * 4 + M * N * out_item),
    )

    return pl.pallas_call(
        _qlinear_kernel,
        out_shape=jax.ShapeDtypeStruct((M, N), out_dtype),
        grid_spec=pltpu.PrefetchScalarGridSpec(
            num_scalar_prefetch=0,
            grid=grid,
            in_specs=[
                pl.BlockSpec((tm, K), lambda i, j: (i, 0)),   # x: streams over M only
                pl.BlockSpec((K, tn), lambda i, j: (0, j)),   # W: VMEM-resident slab
                pl.BlockSpec((1, tn), lambda i, j: (0, j)),   # bias row
            ],
            out_specs=pl.BlockSpec((tm, tn), lambda i, j: (i, j)),
        ),
        compiler_params=pltpu.CompilerParams(
            dimension_semantics=("parallel", "parallel"),
            vmem_limit_bytes=vmem_limit,
        ),
        cost_estimate=cost,
    )(x2d, w, bias2d)


# ----------------------------------------------------------------------------
# QuaternionLinear forward (W is pre-built/cached in `params`)
# ----------------------------------------------------------------------------
def quaternion_linear_forward(x, params, out_dtype=None, force_pallas=False,
                              min_pallas_rows=128):
    K, N = params["K"], params["N"]
    W, bias2d = params["W"], params["bias"]
    if out_dtype is None:
        out_dtype = x.dtype

    if x.ndim == 3:
        T, B, C = x.shape
        x2d = x.reshape(T * B, C)
    elif x.ndim == 2:
        x2d = x
    else:
        raise NotImplementedError("QuaternionLinear accepts 2D or 3D input")
    if x2d.shape[-1] != K:
        raise ValueError(f"expected last dim {K}, got {x2d.shape[-1]}")
    M = x2d.shape[0]

    out = None
    lane_aligned = (K % 128 == 0) and (N % 128 == 0)
    if lane_aligned and (force_pallas or M >= min_pallas_rows):
        out = _qlinear_matmul(x2d, W, bias2d, out_dtype)
    if out is None:
        # XLA fallback: tiny-M, non-lane-aligned features, or oversized weight.
        acc = jnp.dot(x2d.astype(W.dtype), W, preferred_element_type=jnp.float32)
        out = (acc + bias2d).astype(out_dtype)

    if x.ndim == 3:
        out = out.reshape(T, B, N)
    return out


# ----------------------------------------------------------------------------
# References (f32 exact, and bf16-consistent) for testing
# ----------------------------------------------------------------------------
def reference_forward_f32(x, r_w, i_w, j_w, k_w, bias):
    W = _build_quaternion_weight(r_w, i_w, j_w, k_w)
    return jnp.matmul(x, W) + bias


def reference_forward_bf16(x, r_w, i_w, j_w, k_w, bias):
    W = _build_quaternion_weight(r_w, i_w, j_w, k_w)
    W = W.astype(jnp.bfloat16).astype(jnp.float32)
    xb = x.astype(jnp.bfloat16).astype(jnp.float32)
    return jnp.matmul(xb, W) + bias


def _make_case(key, in_features, out_features, x_shape, seed,
               x_dtype=jnp.float32):
    in4, out4 = in_features // 4, out_features // 4
    r_np, i_np, j_np, k_np = quaternion_init_np(in4, out4, seed=seed)
    r_w, i_w, j_w, k_w = map(jnp.asarray, (r_np, i_np, j_np, k_np))
    kx, kb = jax.random.split(key)
    x = jax.random.normal(kx, x_shape, dtype=jnp.float32).astype(x_dtype)
    # Bias init is 0 in the module; use nonzero so the fused bias add is tested.
    bias = 0.1 * jax.random.normal(kb, (out_features,), dtype=jnp.float32)
    params = prepare_quaternion_params(r_w, i_w, j_w, k_w, bias,
                                       compute_dtype=jnp.bfloat16)
    return x, (r_w, i_w, j_w, k_w, bias), params


def _check(out, x, weights, rtol_bf, atol_bf):
    r_w, i_w, j_w, k_w, bias = weights
    xf = x.astype(jnp.float32)
    refbf = reference_forward_bf16(xf, r_w, i_w, j_w, k_w, bias)
    ref32 = reference_forward_f32(xf, r_w, i_w, j_w, k_w, bias)
    out_np = np.asarray(out.astype(jnp.float32)).reshape(refbf.shape)
    # Tight check vs a bf16-operand / f32-accumulate reference (same arithmetic).
    np.testing.assert_allclose(out_np, np.asarray(refbf), rtol=rtol_bf, atol=atol_bf)
    # Loose check vs the exact f32 reference (bf16 rounding tolerance).
    np.testing.assert_allclose(out_np, np.asarray(ref32), rtol=5e-2, atol=5e-2)


if __name__ == "__main__":
    key = jax.random.PRNGKey(0)
    k1, k2, k3 = jax.random.split(key, 3)

    # 1) Lane-aligned 3D f32 input (T=8, B=16, C=128) -> M=128 rows through the
    #    Pallas path, W fully VMEM-resident, single grid step, f32 output.
    x, ws, params = _make_case(k1, in_features=128, out_features=128,
                               x_shape=(8, 16, 128), seed=0)
    out = jax.block_until_ready(
        quaternion_linear_forward(x, params, force_pallas=True))
    assert out.shape == (8, 16, 128) and out.dtype == jnp.float32
    _check(out, x, ws, 2e-3, 2e-3)

    # 2) Lane-aligned 2D bf16 input with M=384 -> 2 M-steps (exercises the
    #    megacore M split, multi-step pipelining, and bf16 output stores).
    x, ws, params = _make_case(k2, in_features=128, out_features=128,
                               x_shape=(384, 128), seed=1, x_dtype=jnp.bfloat16)
    out = jax.block_until_ready(
        quaternion_linear_forward(x, params, out_dtype=jnp.bfloat16,
                                  force_pallas=True))
    assert out.shape == (384, 128) and out.dtype == jnp.bfloat16
    _check(out, x, ws, 2e-2, 2e-2)

    # 3) Small, non-lane-aligned features (in=out=32) route to the fused XLA
    #    fallback per the perf review (no padded compute / post-slice).
    x, ws, params = _make_case(k3, in_features=32, out_features=32,
                               x_shape=(8, 32), seed=2)
    out = jax.block_until_ready(quaternion_linear_forward(x, params))
    assert out.shape == (8, 32)
    _check(out, x, ws, 2e-3, 2e-3)

    print("KERNEL_OK")
</pallas_src>

<mosaic_0001>
module attributes {stable_mosaic.version = 11 : i64} {
  func.func @_qlinear_kernel(%arg0: i32, %arg1: i32, %arg2: memref<128x128xf32, #tpu.memory_space<vmem>>, %arg3: memref<128x128xbf16, #tpu.memory_space<vmem>>, %arg4: memref<1x128xf32, #tpu.memory_space<vmem>>, %arg5: memref<128x128xf32, #tpu.memory_space<vmem>>) attributes {dimension_semantics = [#tpu.dimension_semantics<parallel>, #tpu.dimension_semantics<parallel>], iteration_bounds = array<i64: 1, 1>, scalar_prefetch = 0 : i64, scratch_operands = 0 : i64, tpu.core_type = #tpu.core_type<tc>, window_params = [{transform_indices = @transform_0, window_bounds = array<i64: 128, 128>}, {transform_indices = @transform_1, window_bounds = array<i64: 128, 128>}, {transform_indices = @transform_2, window_bounds = array<i64: 1, 128>}, {transform_indices = @transform_3, window_bounds = array<i64: 128, 128>}]} {
    %c0 = arith.constant 0 : index
    %c0_0 = arith.constant 0 : index
    %0 = vector.load %arg2[%c0, %c0_0] : memref<128x128xf32, #tpu.memory_space<vmem>>, vector<128x128xf32>
    %1 = arith.truncf %0 : vector<128x128xf32> to vector<128x128xbf16>
    %c0_1 = arith.constant 0 : index
    %c0_2 = arith.constant 0 : index
    %2 = vector.load %arg3[%c0_1, %c0_2] : memref<128x128xbf16, #tpu.memory_space<vmem>>, vector<128x128xbf16>
    %cst = arith.constant dense<0.000000e+00> : vector<128x128xf32>
    %3 = tpu.matmul %1, %2, %cst {dimension_numbers = #tpu.dot_dimension_numbers<[1], [0], [0], [1], [0, 0, 1, 1], [], []>} : vector<128x128xbf16>, vector<128x128xbf16>, vector<128x128xf32> -> vector<128x128xf32>
    %c0_3 = arith.constant 0 : index
    %c0_4 = arith.constant 0 : index
    %4 = vector.load %arg4[%c0_3, %c0_4] : memref<1x128xf32, #tpu.memory_space<vmem>>, vector<1x128xf32>
    %5 = vector.broadcast %4 : vector<1x128xf32> to vector<128x128xf32>
    %6 = arith.addf %3, %5 : vector<128x128xf32>
    %c0_5 = arith.constant 0 : index
    %c0_6 = arith.constant 0 : index
    %7 = vector.load %arg5[%c0_5, %c0_6] : memref<128x128xf32, #tpu.memory_space<vmem>>, vector<128x128xf32>
    tpu.vector_store %arg5[%c0_5, %c0_6], %6 {strides = array<i32>} : memref<128x128xf32, #tpu.memory_space<vmem>>, vector<128x128xf32>,
    return
  }
  func.func @transform_0(%arg0: i32, %arg1: i32) -> (i32, i32) {
    %c0_i32 = arith.constant 0 : i32
    %c0_i32_0 = arith.constant 0 : i32
    return %arg0, %c0_i32 : i32, i32
  }
  func.func @transform_1(%arg0: i32, %arg1: i32) -> (i32, i32) {
    %c0_i32 = arith.constant 0 : i32
    %c0_i32_0 = arith.constant 0 : i32
    return %c0_i32, %arg1 : i32, i32
  }
  func.func @transform_2(%arg0: i32, %arg1: i32) -> (i32, i32) {
    %c0_i32 = arith.constant 0 : i32
    %c0_i32_0 = arith.constant 0 : i32
    return %c0_i32, %arg1 : i32, i32
  }
  func.func @transform_3(%arg0: i32, %arg1: i32) -> (i32, i32) {
    %c0_i32 = arith.constant 0 : i32
    return %arg0, %arg1 : i32, i32
  }
}

</mosaic_0001>

<bundles_post_ra>
// kernel: tpu_custom_call.1
= control target key start
LH: loop header
LB: loop body
LE: loop exit
PB: predicated region body
PF: predicated region fallthrough
CT: control target
= control target key end

     0   :  { %8 = vsyncpa [#allocation3], 0  ;;  %s502_s0 = inlined_call_operand.hbm [shape: f32[128,128], index: 0, kind: input, shape index: {}]   ;;  %s503_s1 = inlined_call_operand.hbm [shape: bf16[128,128], index: 1, kind: input, shape index: {}]   ;;  %s504_s2 = inlined_call_operand.vmem [shape: f32[1,128], index: 2, kind: input, shape index: {}]   ;;  %s505_s3 = inlined_call_operand.hbm [shape: f32[128,128], index: 3, kind: output, shape index: {}]  }
   0x1   :  { %9 = vsyncpa [#allocation6], 0 }
   0x2   :  { %10 = vsyncpa [#allocation4], 0  ;;  %s430_s12 = smov [#allocation2]   ;;  %s358_s16 = scalar_lea.hbm %s502_s0, 2048 }
   0x3   :  { %s16_s13 = sshll.u32 %s430_s12, 4  ;;  %p359_p0 = scmp.ne.s32.totalorder %s502_s0, %s358_s16  ;;  %s17_s13 = int_to_ptr.vmem [resolvable:$true] %s16_s13 }
   0x4   :  { %p362_p1 = scmp.lt.u32.totalorder %s358_s16, %s502_s0 }
   0x6   :  { %p364_p2 = pnand %p362_p1, %p359_p0 }
   0x8   :  { %367 = shalt.err (!%p364_p2)
}
   0x9   :  { %s368_s21 = scalar_lea.vmem %s17_s13, 2048  ;;  %p373_p4 = scmp.lt.s32.totalorder %s17_s13, %s17_s13 }
   0xa   :  { %p369_p3 = scmp.ne.s32.totalorder %s17_s13, %s368_s21  ;;  %p374_p5 = scmp.lt.s32.totalorder %s368_s21, %s368_s21 }
   0xc   :  { %p375_p6 = por %p374_p5, %p373_p4 }
   0xe   :  { %p376_p7 = pnand %p375_p6, %p369_p3 }
  0x10   :  { %379 = shalt.err (!%p376_p7)
}
  0x11   :  { %s431_s22 = smov 128   ;;  %s432_s23 = smov 8  }
  0x12   :  { %22 = dma.hbm_to_vmem [thread:$0]  %s502_s0, 2048, %s17_s13, [#allocation3], %s431_s22, %s431_s22, %s432_s23  }
  0x13   :  { %s433_s26 = smov [#allocation5]   ;;  %s380_s30 = scalar_lea.hbm %s503_s1, 1024 }
  0x14   :  { %s28_s27 = sshll.u32 %s433_s26, 4  ;;  %p381_p8 = scmp.ne.s32.totalorder %s503_s1, %s380_s30  ;;  %s29_s27 = int_to_ptr.vmem [resolvable:$true] %s28_s27 }
  0x15   :  { %p384_p9 = scmp.lt.u32.totalorder %s380_s30, %s503_s1 }
  0x17   :  { %p386_p10 = pnand %p384_p9, %p381_p8 }
  0x19   :  { %389 = shalt.err (!%p386_p10)
}
  0x1a   :  { %s390_s8 = scalar_lea.vmem %s29_s27, 1024  ;;  %p395_p12 = scmp.lt.s32.totalorder %s29_s27, %s29_s27 }
  0x1b   :  { %p391_p11 = scmp.ne.s32.totalorder %s29_s27, %s390_s8  ;;  %p396_p13 = scmp.lt.s32.totalorder %s390_s8, %s390_s8 }
  0x1d   :  { %p397_p0 = por %p396_p13, %p395_p12 }
  0x1f   :  { %p398_p1 = pnand %p397_p0, %p391_p11 }
  0x21   :  { %401 = shalt.err (!%p398_p1)
}
  0x22   :  { %s434_s0 = smov 64   ;;  %s435_s9 = smov 4  }
  0x23   :  { %34 = dma.hbm_to_vmem [thread:$0]  %s503_s1, 1024, %s29_s27, [#allocation6], %s434_s0, %s434_s0, %s435_s9  }
  0x24   :  { %424 = dma.done.wait [#allocation3], 2048  }
  0x25   :  { %425 = vsyncadd [#allocation3], 4294965248 }
  0x26   :  { %426 = dma.done.wait [#allocation6], 1024  }
  0x27   :  { %427 = vsyncadd [#allocation6], 4294966272  ;;  %v350_v0 = vld [vmem:[#allocation5] sm:$0xff]   ;;  %v351_v1 = vld [vmem:[#allocation5 + $0x8] sm:$0xff]  }
  0x28   :  { %295 = vmatprep.subr.bf16.mxu0 %v350_v0  ;;  %327 = vmatprep.subr.bf16.mxu1 %v350_v0  ;;  %v352_v2 = vld [vmem:[#allocation5 + $0x10] sm:$0xff]   ;;  %v353_v3 = vld [vmem:[#allocation5 + $0x18] sm:$0xff]   ;;  %v44_v4 = vld [vmem:[#allocation2] sm:$0xff] }
  0x29   :  { %296 = vmatpush3.bf16.msra.mxu0 %v350_v0  ;;  %335 = vmatpush3.bf16.msra.mxu1 %v350_v0  ;;  %v45_v5 = vld [vmem:[#allocation2 + $0x8] sm:$0xff]  ;;  %v52_v6 = vld [vmem:[#allocation2 + $0x40] sm:$0xff]  ;;  %v356_v12 = vld [vmem:[#allocation5 + $0x30] sm:$0xff]  }
  0x2a   :  { %297 = vmatprep.subr.bf16.mxu0 %v351_v1  ;;  %328 = vmatprep.subr.bf16.mxu1 %v351_v1  ;;  %v60_v7 = vpack.c.bf16 %v45_v5, %v44_v4  ;;  %v53_v8 = vld [vmem:[#allocation2 + $0x48] sm:$0xff]  ;;  %v354_v10 = vld [vmem:[#allocation5 + $0x20] sm:$0xff]   ;;  %v357_v13 = vld [vmem:[#allocation5 + $0x38] sm:$0xff]  }
  0x2b   :  { %v64_v9 = vpack.c.bf16 %v53_v8, %v52_v6  ;;  %v355_v11 = vld [vmem:[#allocation5 + $0x28] sm:$0xff]   ;;  %v46_v14 = vld [vmem:[#allocation2 + $0x10] sm:$0xff]  ;;  %v47_v15 = vld [vmem:[#allocation2 + $0x18] sm:$0xff] }
  0x2c   :  { %311 = vmatprep.mubr.bf16.mxu0 %v60_v7  ;;  %v54_v16 = vld [vmem:[#allocation2 + $0x50] sm:$0xff]  ;;  %v55_v17 = vld [vmem:[#allocation2 + $0x58] sm:$0xff]  ;;  %v48_v18 = vld [vmem:[#allocation2 + $0x20] sm:$0xff]  ;;  %v61_v22 = vpack.c.bf16 %v47_v15, %v46_v14 }
  0x2d   :  { %298 = vmatpush3.bf16.msra.mxu0 %v351_v1  ;;  %336 = vmatpush3.bf16.msra.mxu1 %v351_v1  ;;  %v49_v19 = vld [vmem:[#allocation2 + $0x28] sm:$0xff]  ;;  %v56_v20 = vld [vmem:[#allocation2 + $0x60] sm:$0xff]  ;;  %v65_v23 = vpack.c.bf16 %v55_v17, %v54_v16  ;;  %v50_v26 = vld [vmem:[#allocation2 + $0x30] sm:$0xff] }
  0x2e   :  { %299 = vmatprep.subr.bf16.mxu0 %v352_v2  ;;  %329 = vmatprep.subr.bf16.mxu1 %v352_v2  ;;  %v57_v21 = vld [vmem:[#allocation2 + $0x68] sm:$0xff]  ;;  %v62_v24 = vpack.c.bf16 %v49_v19, %v48_v18  ;;  %v51_v27 = vld [vmem:[#allocation2 + $0x38] sm:$0xff]  ;;  %v58_v28 = vld [vmem:[#allocation2 + $0x70] sm:$0xff] }
  0x2f   :  { %319 = vmatprep.mubr.bf16.mxu1 %v64_v9  ;;  %v66_v25 = vpack.c.bf16 %v57_v21, %v56_v20  ;;  %v59_v29 = vld [vmem:[#allocation2 + $0x78] sm:$0xff]  ;;  %v63_v30 = vpack.c.bf16 %v51_v27, %v50_v26  ;;  %v270_v32 = vld [vmem:[%s504_s2] ss:$0 sm:$0xff]  ;;  %s436_s2 = smov [#allocation7]  }
  0x30   :  { %v67_v31 = vpack.c.bf16 %v59_v29, %v58_v28  ;;  %s257_s13 = sshll.u32 %s436_s2, 4  ;;  %s258_s13 = int_to_ptr.vmem [resolvable:$true] %s257_s13 }
  0x31   :  { %300 = vmatpush3.bf16.msra.mxu0 %v352_v2  ;;  %337 = vmatpush3.bf16.msra.mxu1 %v352_v2  ;;  %s402_s14 = scalar_lea.vmem %s258_s13, 2048  ;;  %p407_p3 = scmp.lt.s32.totalorder %s258_s13, %s258_s13 }
  0x32   :  { %301 = vmatprep.subr.bf16.mxu0 %v353_v3  ;;  %330 = vmatprep.subr.bf16.mxu1 %v353_v3  ;;  %p403_p2 = scmp.ne.s32.totalorder %s258_s13, %s402_s14  ;;  %p408_p4 = scmp.lt.s32.totalorder %s402_s14, %s402_s14 }
  0x34   :  { %p409_p5 = por %p408_p4, %p407_p3 }
  0x35   :  { %302 = vmatpush3.bf16.msra.mxu0 %v353_v3  ;;  %338 = vmatpush3.bf16.msra.mxu1 %v353_v3 }
  0x36   :  { %303 = vmatprep.subr.bf16.mxu0 %v354_v10  ;;  %331 = vmatprep.subr.bf16.mxu1 %v354_v10  ;;  %p410_p6 = pnand %p409_p5, %p403_p2 }
  0x39   :  { %304 = vmatpush3.bf16.msra.mxu0 %v354_v10  ;;  %339 = vmatpush3.bf16.msra.mxu1 %v354_v10 }
  0x3a   :  { %305 = vmatprep.subr.bf16.mxu0 %v355_v11  ;;  %332 = vmatprep.subr.bf16.mxu1 %v355_v11 }
  0x3d   :  { %306 = vmatpush3.bf16.msra.mxu0 %v355_v11  ;;  %340 = vmatpush3.bf16.msra.mxu1 %v355_v11 }
  0x3e   :  { %307 = vmatprep.subr.bf16.mxu0 %v356_v12  ;;  %333 = vmatprep.subr.bf16.mxu1 %v356_v12 }
  0x41   :  { %308 = vmatpush3.bf16.msra.mxu0 %v356_v12  ;;  %341 = vmatpush3.bf16.msra.mxu1 %v356_v12 }
  0x42   :  { %309 = vmatprep.subr.bf16.mxu0 %v357_v13  ;;  %334 = vmatprep.subr.bf16.mxu1 %v357_v13 }
  0x45   :  { %310 = vmatpush3.bf16.msra.mxu0 %v357_v13  ;;  %342 = vmatpush3.bf16.msra.mxu1 %v357_v13 }
  0x48   :  { %312 = vmatmul.mubr.bf16.vlgmr.msra.gmra.mrb[0].mxu0 %v61_v22  ;;  %320 = vmatmul.mubr.bf16.vlgmr.msra.gmra.mrb[0].mxu1 %v65_v23 }
  0x49   :  { %315 = vmatprep.mubr.bf16.mxu0 %v62_v24  ;;  %323 = vmatprep.mubr.bf16.mxu1 %v66_v25 }
  0x50   :  { %316 = vmatmul.mubr.bf16.gmra.mrb[4].mxu0 %v63_v30  ;;  %324 = vmatmul.mubr.bf16.gmra.mrb[4].mxu1 %v67_v31 }
 0x11b   :  { %v313_v33 = vpop.f32.mrb[0].mxu0  ;;  %v321_v34 = vpop.f32.mrb[0].mxu1 }
 0x11c   :  { %v182_v35 = vadd.f32 %v313_v33, %v270_v32  ;;  %v214_v36 = vadd.f32 %v321_v34, %v270_v32  ;;  %v173_v37 = vpop.f32.mrb[1].mxu0  ;;  %v205_v38 = vpop.f32.mrb[1].mxu1 }
 0x11d   :  { %v174_v39 = vadd.f32 %v270_v32, %v173_v37  ;;  %v206_v40 = vadd.f32 %v270_v32, %v205_v38  ;;  %v314_v41 = vpop.f32.mrb[2].mxu0  ;;  %v322_v42 = vpop.f32.mrb[2].mxu1 }
 0x11e   :  { %238 = vst [vmem:[#allocation7 + $0x10] sm:$0xff] %v182_v35  ;;  %246 = vst [vmem:[#allocation7 + $0x50] sm:$0xff] %v214_v36  ;;  %v185_v43 = vadd.f32 %v314_v41, %v270_v32  ;;  %v217_v44 = vadd.f32 %v322_v42, %v270_v32  ;;  %v176_v45 = vpop.f32.mrb[3].mxu0  ;;  %v208_v46 = vpop.f32.mrb[3].mxu1 }
 0x11f   :  { %236 = vst [vmem:[#allocation7] sm:$0xff] %v174_v39  ;;  %244 = vst [vmem:[#allocation7 + $0x40] sm:$0xff] %v206_v40  ;;  %v177_v47 = vadd.f32 %v270_v32, %v176_v45  ;;  %v209_v48 = vadd.f32 %v270_v32, %v208_v46 }
 0x120   :  { %239 = vst [vmem:[#allocation7 + $0x18] sm:$0xff] %v185_v43  ;;  %247 = vst [vmem:[#allocation7 + $0x58] sm:$0xff] %v217_v44 }
 0x121   :  { %237 = vst [vmem:[#allocation7 + $0x8] sm:$0xff] %v177_v47  ;;  %245 = vst [vmem:[#allocation7 + $0x48] sm:$0xff] %v209_v48 }
 0x123   :  { %v317_v49 = vpop.f32.mrb[4].mxu0  ;;  %v325_v50 = vpop.f32.mrb[4].mxu1 }
 0x124   :  { %v198_v51 = vadd.f32 %v317_v49, %v270_v32  ;;  %v230_v52 = vadd.f32 %v325_v50, %v270_v32  ;;  %v189_v53 = vpop.f32.mrb[5].mxu0  ;;  %v221_v54 = vpop.f32.mrb[5].mxu1 }
 0x125   :  { %v190_v55 = vadd.f32 %v270_v32, %v189_v53  ;;  %v222_v56 = vadd.f32 %v270_v32, %v221_v54  ;;  %v318_v57 = vpop.f32.mrb[6].mxu0  ;;  %v326_v58 = vpop.f32.mrb[6].mxu1 }
 0x126   :  { %242 = vst [vmem:[#allocation7 + $0x30] sm:$0xff] %v198_v51  ;;  %250 = vst [vmem:[#allocation7 + $0x70] sm:$0xff] %v230_v52  ;;  %v201_v59 = vadd.f32 %v318_v57, %v270_v32  ;;  %v233_v60 = vadd.f32 %v326_v58, %v270_v32  ;;  %v192_v61 = vpop.f32.mrb[7].mxu0  ;;  %v224_v62 = vpop.f32.mrb[7].mxu1 }
 0x127   :  { %240 = vst [vmem:[#allocation7 + $0x20] sm:$0xff] %v190_v55  ;;  %248 = vst [vmem:[#allocation7 + $0x60] sm:$0xff] %v222_v56  ;;  %v193_v63 = vadd.f32 %v270_v32, %v192_v61  ;;  %v225_v0 = vadd.f32 %v270_v32, %v224_v62 }
 0x128   :  { %243 = vst [vmem:[#allocation7 + $0x38] sm:$0xff] %v201_v59  ;;  %251 = vst [vmem:[#allocation7 + $0x78] sm:$0xff] %v233_v60 }
 0x129   :  { %241 = vst [vmem:[#allocation7 + $0x28] sm:$0xff] %v193_v63  ;;  %249 = vst [vmem:[#allocation7 + $0x68] sm:$0xff] %v225_v0 }
 0x12a   :  { %413 = shalt.err (!%p410_p6)
}
 0x12b   :  { %s414_s17 = scalar_lea.hbm %s505_s3, 2048 }
 0x12c   :  { %p415_p7 = scmp.ne.s32.totalorder %s505_s3, %s414_s17  ;;  %p418_p8 = scmp.lt.u32.totalorder %s414_s17, %s505_s3 }
 0x12e   :  { %p420_p9 = pnand %p418_p8, %p415_p7 }
 0x130   :  { %423 = shalt.err (!%p420_p9)
}
 0x131   :  { %263 = dma.vmem_to_hbm [thread:$0]  %s258_s13, 2048, %s505_s3, [#allocation4], %s431_s22, %s431_s22, %s432_s23  }
 0x132   :  { %428 = dma.done.wait [#allocation4], 2048  }
 0x133   :  { %429 = vsyncadd [#allocation4], 4294965248 }
 0x134   :  { %267 = vsyncpa [#allocation3], 1 }
 0x135   :  { %268 = vsyncpa [#allocation6], 1 }
 0x136   :  { %269 = vsyncpa [#allocation4], 1 }

</bundles_post_ra>
